<compile_context>
chip_gen: v7x
topology: tpu7x:2x2x1
jax: 0.10.0
libtpu: 0.0.40
codegen_flags: <defaults>
</compile_context>

<pallas_src>
from functools import partial

import jax
import jax.numpy as jnp
from jax.experimental import pallas as pl
from jax.experimental.pallas import tpu as pltpu


# ----------------------------------------------------------------------------
# Kernel: one whole-array HBM -> HBM DMA (forward of FeatureReroute is the
# identity, so a straight copy is all the kernel has to do).
# ----------------------------------------------------------------------------
def _dma_copy_kernel(x_ref, o_ref, sem):
    # x_ref / o_ref are raw HBM refs (memory_space=pl.ANY): issue a single
    # whole-array DMA and wait.  No VMEM staging, no vld/vst, no grid.
    cp = pltpu.make_async_copy(x_ref, o_ref, sem)
    cp.start()
    cp.wait()


def _pallas_identity(x):
    """Copy x via one HBM->HBM DMA inside a Pallas kernel."""
    return pl.pallas_call(
        _dma_copy_kernel,
        out_shape=jax.ShapeDtypeStruct(x.shape, x.dtype),
        in_specs=[pl.BlockSpec(memory_space=pl.ANY)],
        out_specs=pl.BlockSpec(memory_space=pl.ANY),
        scratch_shapes=[pltpu.SemaphoreType.DMA],
    )(x)


# ----------------------------------------------------------------------------
# custom_vjp reproducing the .detach() gradient routing of FeatureReroute.
#   x_plus gets gradient only through channels [:n1]
#   x_sub  gets gradient only through channels [n1:]
# ----------------------------------------------------------------------------
@partial(jax.custom_vjp, nondiff_argnums=(1,))
def _reroute(x, n1):
    x_plus = _pallas_identity(x)  # one DMA copy
    x_sub = x                     # forward-identical; no extra HBM traffic
    return x_plus, x_sub


def _reroute_fwd(x, n1):
    return _reroute(x, n1), None


def _reroute_bwd(n1, _res, cotangents):
    g_plus, g_sub = cotangents
    dx = jnp.concatenate([g_plus[..., :n1], g_sub[..., n1:]], axis=-1)
    return (dx,)


_reroute.defvjp(_reroute_fwd, _reroute_bwd)


def feature_reroute(x, num_channel: int, ratio: float = 0.5):
    """Pallas implementation of FeatureReroute.forward.

    x: (..., C) with C == num_channel.  Returns (x_plus, x_sub).
    """
    ratio = max(min(ratio, 1.0), 0.0)
    # Matches the PyTorch module exactly: round(num_channel * ratio).
    n1 = round(num_channel * ratio)
    assert x.shape[-1] == num_channel
    return _reroute(x, n1)


if __name__ == "__main__":
    # Small BERT-style feature tensor: (batch, seq, hidden).
    B, S, C = 2, 8, 32
    ratio = 0.5

    key = jax.random.PRNGKey(0)
    x = jax.random.normal(key, (B, S, C), dtype=jnp.float32)

    x_plus, x_sub = feature_reroute(x, num_channel=C, ratio=ratio)
    jax.block_until_ready((x_plus, x_sub))

    # Forward semantics: both outputs equal x.
    assert x_plus.shape == x.shape and x_sub.shape == x.shape
    assert jnp.array_equal(x_plus, x), "x_plus mismatch"
    assert jnp.array_equal(x_sub, x), "x_sub mismatch"

    # Gradient routing check (the .detach() semantics).
    n1 = round(C * ratio)

    def loss(xx):
        p, s = feature_reroute(xx, num_channel=C, ratio=ratio)
        return (2.0 * p).sum() + (3.0 * s).sum()

    g = jax.grad(loss)(x)
    expected = jnp.concatenate(
        [jnp.full((B, S, n1), 2.0), jnp.full((B, S, C - n1), 3.0)], axis=-1
    )
    assert jnp.allclose(g, expected), "gradient routing mismatch"

    print("KERNEL_OK")
</pallas_src>

<mosaic_0001>
module attributes {stable_mosaic.version = 11 : i64} {
  func.func @_dma_copy_kernel(%arg0: memref<2x8x32xf32, #tpu.memory_space<any>>, %arg1: memref<2x8x32xf32, #tpu.memory_space<any>>, %arg2: memref<!tpu.dma_semaphore, #tpu.memory_space<semaphore_mem>>) attributes {dimension_semantics = [], scalar_prefetch = 0 : i64, scratch_operands = 1 : i64, tpu.core_type = #tpu.core_type<tc>} {
    tpu.enqueue_dma source(%arg0 : memref<2x8x32xf32, #tpu.memory_space<any>>) target(%arg1 : memref<2x8x32xf32, #tpu.memory_space<any>>) target_semaphore(%arg2 : memref<!tpu.dma_semaphore, #tpu.memory_space<semaphore_mem>>)
    tpu.wait_dma2 semaphore(%arg2 : memref<!tpu.dma_semaphore, #tpu.memory_space<semaphore_mem>>) src(%arg0 : memref<2x8x32xf32, #tpu.memory_space<any>>) dst(%arg1 : memref<2x8x32xf32, #tpu.memory_space<any>>)
    return
  }
}

</mosaic_0001>

<bundles_post_ra>
// kernel: tpu_custom_call.1
= control target key start
LH: loop header
LB: loop body
LE: loop exit
PB: predicated region body
PF: predicated region fallthrough
CT: control target
= control target key end

     0   :  { %s35_s6 = smov [#allocation2]   ;;  %s36_s7 = smov [#allocation3]   ;;  %s54_s0 = inlined_call_operand.hbm [shape: f32[2,8,32], index: 0, kind: input, shape index: {}]   ;;  %s55_s1 = inlined_call_operand.hbm [shape: f32[2,8,32], index: 1, kind: output, shape index: {}]  }
   0x1   :  { %s37_s8 = smov 0  }
   0x2   :  { %18 = dma.general %s54_s0, 256, %s55_s1, %s35_s6, %s36_s7, [#allocation4], %s37_s8, 0  }
   0x3   :  { %33 = dma.done.wait [#allocation2], 256 }
   0x4   :  { %34 = vsyncadd [#allocation2], 4294967040 }
   0x5   :  { %23 = vsyncmov [#allocation2] }
   0x8   :  { %s24_s13 = vpop.sfrf %23 }
   0x9   :  { %p29_p0 = scmp.ne.s32.totalorder %s24_s13, 0 }
   0xb   :  { %28 = shalt.err (%p29_p0)  }

</bundles_post_ra>
